<compile_context>
chip_gen: v5e
topology: v5e:2x2
jax: 0.10.0
libtpu: 0.0.40
codegen_flags: <defaults>
</compile_context>

<pallas_src>
import jax
import jax.numpy as jnp
from jax import lax
from jax.experimental import pallas as pl
from jax.experimental.pallas import tpu as pltpu


def _round_up(x, m):
    return ((x + m - 1) // m) * m


def _make_fused_kernel(o_total, hp, compute_dtype):
    """Build the per-batch fused kernel (closed over static sizes)."""

    def kernel(x_ref, wab_ref, bab_ref, wall_ref, o_ref):
        # nn.LeakyReLU() default negative_slope = 0.01; dropout p=0.0 -> identity.
        # TODO(synk): dropout > 0 would need pltpu.prng_seed / prng_random_bits masking.
        x = x_ref[...]                                     # (M, I)
        act = jnp.where(x >= 0.0, x, 0.01 * x).astype(compute_dtype)

        # Both linear projections in one MXU matmul: (M, I) @ (I, 2*Hp).
        # The bias=True "ones" column and the zero padding are baked into the
        # padded weight/bias, so `ab` already holds [A_ext | B_ext].
        ab = (jnp.dot(act, wab_ref[...], preferred_element_type=jnp.float32)
              + bab_ref[...])                              # (M, 2*Hp) f32
        a = ab[:, :hp].astype(compute_dtype)               # A_ext  (M, Hp)
        b = ab[:, hp:].astype(compute_dtype)               # B_ext  (M, Hp)

        # First biaffine contraction batched over all output channels:
        # lane-dense N = O_total*Hp keeps the MXU full instead of O tiny matmuls.
        t = jnp.dot(a, wall_ref[...], preferred_element_type=jnp.float32)  # (M, O*Hp)

        # Second contraction per output channel; contract the feature axis of
        # both operands directly (no transpose of B). Slices are 128-aligned.
        for o in range(o_total):
            t_o = t[:, o * hp:(o + 1) * hp].astype(compute_dtype)          # (M, Hp)
            out_o = lax.dot_general(t_o, b, (((1,), (1,)), ((), ())),
                                    preferred_element_type=jnp.float32)    # (M, N)
            o_ref[o] = out_o.astype(o_ref.dtype)

    return kernel


def biaffine_forward(emb, wa, ba, wb, bb, biaffine_w, *,
                     output_size, multi_matrix=1, use_bias=True,
                     compute_dtype=jnp.float32):
    """Forward pass matching BiAffine.forward (dropout p=0.0).

    emb:        (B, M, I) float32
    wa, wb:     (I, H)    linear weights stored as (in, out) for x @ W
    ba, bb:     (1, H)    linear biases
    biaffine_w: (H+1, output_size*multi_matrix, H+1)  [or (H, O, H) if use_bias=False]
    returns:    (B, M, M, output_size) or (B, multi_matrix, M, M, output_size)
    """
    B, M, I = emb.shape
    H = wa.shape[1]
    H1 = H + 1 if use_bias else H
    O_total = output_size * multi_matrix
    assert biaffine_w.shape == (H1, O_total, H1), biaffine_w.shape

    # Pad the contraction width to a lane-dense multiple of 128 (free: zeros).
    Hp = _round_up(H1, 128)
    f32 = jnp.float32

    def pad_proj(w, bias, add_one):
        w_p = jnp.zeros((I, Hp), f32).at[:, :H].set(w.astype(f32))
        b_p = jnp.zeros((1, Hp), f32).at[:, :H].set(bias.astype(f32))
        if add_one:
            # bias=True "ones" column baked into the linear bias (weight col is 0).
            b_p = b_p.at[:, H].set(1.0)
        return w_p, b_p

    wa_p, ba_p = pad_proj(wa, ba, use_bias)
    wb_p, bb_p = pad_proj(wb, bb, use_bias)
    w_ab = jnp.concatenate([wa_p, wb_p], axis=1).astype(compute_dtype)   # (I, 2*Hp)
    b_ab = jnp.concatenate([ba_p, bb_p], axis=1)                          # (1, 2*Hp) f32

    # Zero-pad biaffine weight to (Hp, O, Hp) and flatten (o, j) onto one lane
    # axis: W_all[i, o*Hp + j] = biaffine_w[i, o, j].
    w_pad = jnp.zeros((Hp, O_total, Hp), f32).at[:H1, :, :H1].set(biaffine_w.astype(f32))
    w_all = w_pad.reshape(Hp, O_total * Hp).astype(compute_dtype)

    kernel = _make_fused_kernel(O_total, Hp, compute_dtype)

    out = pl.pallas_call(
        kernel,
        out_shape=jax.ShapeDtypeStruct((B, O_total, M, M), f32),
        grid=(B,),
        in_specs=[
            pl.BlockSpec((None, M, I), lambda b: (b, 0, 0)),        # embedding tile
            pl.BlockSpec((I, 2 * Hp), lambda b: (0, 0)),            # fused proj weight (VMEM-resident)
            pl.BlockSpec((1, 2 * Hp), lambda b: (0, 0)),            # fused proj bias  (VMEM-resident)
            pl.BlockSpec((Hp, O_total * Hp), lambda b: (0, 0)),     # biaffine weight  (VMEM-resident)
        ],
        out_specs=pl.BlockSpec((None, O_total, M, M), lambda b: (b, 0, 0, 0)),
        compiler_params=pltpu.CompilerParams(
            dimension_semantics=("parallel",),      # batch axis shards across TCs (v7x)
            vmem_limit_bytes=32 * 1024 * 1024,      # safe on v5e/v6e/v7x
        ),
    )(emb, w_ab, b_ab, w_all)

    # Relayout to the PyTorch convention. Consumers that can accept the
    # (B, O, M, N) layout should skip this transpose (saves one HBM pass over
    # the largest tensor).
    if multi_matrix > 1:
        out = out.reshape(B, multi_matrix, output_size, M, M)
        out = jnp.transpose(out, (0, 1, 3, 4, 2))    # (B, multi, M, N, out)
    else:
        out = jnp.transpose(out, (0, 2, 3, 1))       # (B, M, N, out)
    return out


# ---------------- pure-JAX reference for correctness check ----------------

def biaffine_reference(emb, wa, ba, wb, bb, biaffine_w, *,
                       output_size, multi_matrix=1, use_bias=True):
    act = jnp.where(emb >= 0, emb, 0.01 * emb)
    a = act @ wa + ba
    b = act @ wb + bb
    if use_bias:
        ones = jnp.ones(a.shape[:-1] + (1,), a.dtype)
        a = jnp.concatenate([a, ones], axis=-1)
        b = jnp.concatenate([b, ones], axis=-1)
    out = jnp.einsum('bmi,ioj,bnj->bmno', a, biaffine_w, b)
    if multi_matrix > 1:
        B, M, N, _ = out.shape
        out = out.reshape(B, M, N, multi_matrix, output_size)
        out = jnp.transpose(out, (0, 3, 1, 2, 4))
    return out


if __name__ == "__main__":
    # Config: input_size=32, hidden_size=0 -> 32, output_size=4, multi_matrix=1,
    # bias=True, active='leaky_relu', dropout=0.0
    B, M, INPUT, HIDDEN, OUT, MULTI = 2, 8, 32, 32, 4, 1
    H1 = HIDDEN + 1

    key = jax.random.PRNGKey(0)
    k_emb, k_wa, k_ba, k_wb, k_bb, k_w = jax.random.split(key, 6)

    emb = jax.random.normal(k_emb, (B, M, INPUT), jnp.float32)
    # linear weights stored as (in, out) for direct x @ W
    wa = jax.random.normal(k_wa, (INPUT, HIDDEN), jnp.float32) * 0.1
    ba = jax.random.normal(k_ba, (1, HIDDEN), jnp.float32) * 0.1
    wb = jax.random.normal(k_wb, (INPUT, HIDDEN), jnp.float32) * 0.1
    bb = jax.random.normal(k_bb, (1, HIDDEN), jnp.float32) * 0.1
    biaffine_w = jax.random.normal(k_w, (H1, OUT * MULTI, H1), jnp.float32) * 0.1

    out = biaffine_forward(emb, wa, ba, wb, bb, biaffine_w,
                           output_size=OUT, multi_matrix=MULTI, use_bias=True)
    out = jax.block_until_ready(out)

    ref = biaffine_reference(emb, wa, ba, wb, bb, biaffine_w,
                             output_size=OUT, multi_matrix=MULTI, use_bias=True)

    assert out.shape == (B, M, M, OUT), out.shape
    assert jnp.allclose(out, ref, atol=1e-4, rtol=1e-4), \
        float(jnp.max(jnp.abs(out - ref)))
    print("KERNEL_OK")
</pallas_src>

<mosaic_0001>
module attributes {stable_mosaic.version = 11 : i64} {
  func.func @kernel(%arg0: i32, %arg1: memref<1x8x32xf32, #tpu.memory_space<vmem>>, %arg2: memref<32x256xf32, #tpu.memory_space<vmem>>, %arg3: memref<1x256xf32, #tpu.memory_space<vmem>>, %arg4: memref<128x512xf32, #tpu.memory_space<vmem>>, %arg5: memref<1x4x8x8xf32, #tpu.memory_space<vmem>>) attributes {dimension_semantics = [#tpu.dimension_semantics<parallel>], iteration_bounds = array<i64: 2>, scalar_prefetch = 0 : i64, scratch_operands = 0 : i64, tpu.core_type = #tpu.core_type<tc>, window_params = [{transform_indices = @transform_0, window_bounds = array<i64: 1, 8, 32>}, {pipeline_mode = #tpu.pipeline_mode<synchronous>, transform_indices = @transform_1, window_bounds = array<i64: 32, 256>}, {pipeline_mode = #tpu.pipeline_mode<synchronous>, transform_indices = @transform_2, window_bounds = array<i64: 1, 256>}, {pipeline_mode = #tpu.pipeline_mode<synchronous>, transform_indices = @transform_3, window_bounds = array<i64: 128, 512>}, {transform_indices = @transform_4, window_bounds = array<i64: 1, 4, 8, 8>}]} {
    %c0 = arith.constant 0 : index
    %c0_0 = arith.constant 0 : index
    %c0_1 = arith.constant 0 : index
    %0 = vector.load %arg1[%c0, %c0_0, %c0_1] : memref<1x8x32xf32, #tpu.memory_space<vmem>>, vector<1x8x32xf32>
    %1 = vector.shape_cast %0 : vector<1x8x32xf32> to vector<8x32xf32>
    %cst = arith.constant 0.000000e+00 : f32
    %2 = vector.broadcast %cst : f32 to vector<8x32xf32>
    %3 = arith.cmpf oge, %1, %2 : vector<8x32xf32>
    %cst_2 = arith.constant 0.00999999977 : f32
    %4 = vector.broadcast %cst_2 : f32 to vector<8x32xf32>
    %5 = arith.mulf %4, %1 : vector<8x32xf32>
    %6 = arith.select %3, %1, %5 : vector<8x32xi1>, vector<8x32xf32>
    %c0_3 = arith.constant 0 : index
    %c0_4 = arith.constant 0 : index
    %7 = vector.load %arg2[%c0_3, %c0_4] : memref<32x256xf32, #tpu.memory_space<vmem>>, vector<32x256xf32>
    %cst_5 = arith.constant dense<0.000000e+00> : vector<8x256xf32>
    %8 = tpu.matmul %6, %7, %cst_5 {dimension_numbers = #tpu.dot_dimension_numbers<[1], [0], [0], [1], [0, 0, 1, 1], [], []>} : vector<8x32xf32>, vector<32x256xf32>, vector<8x256xf32> -> vector<8x256xf32>
    %c0_6 = arith.constant 0 : index
    %c0_7 = arith.constant 0 : index
    %9 = vector.load %arg3[%c0_6, %c0_7] : memref<1x256xf32, #tpu.memory_space<vmem>>, vector<1x256xf32>
    %10 = vector.broadcast %9 : vector<1x256xf32> to vector<8x256xf32>
    %11 = arith.addf %8, %10 : vector<8x256xf32>
    %12 = vector.extract_strided_slice %11 {offsets = [0, 0], sizes = [8, 128], strides = [1, 1]} : vector<8x256xf32> to vector<8x128xf32>
    %13 = vector.extract_strided_slice %11 {offsets = [0, 128], sizes = [8, 128], strides = [1, 1]} : vector<8x256xf32> to vector<8x128xf32>
    %c0_8 = arith.constant 0 : index
    %c0_9 = arith.constant 0 : index
    %14 = vector.load %arg4[%c0_8, %c0_9] : memref<128x512xf32, #tpu.memory_space<vmem>>, vector<128x512xf32>
    %cst_10 = arith.constant dense<0.000000e+00> : vector<8x512xf32>
    %15 = tpu.matmul %12, %14, %cst_10 {dimension_numbers = #tpu.dot_dimension_numbers<[1], [0], [0], [1], [0, 0, 1, 1], [], []>} : vector<8x128xf32>, vector<128x512xf32>, vector<8x512xf32> -> vector<8x512xf32>
    %16 = vector.extract_strided_slice %15 {offsets = [0, 0], sizes = [8, 128], strides = [1, 1]} : vector<8x512xf32> to vector<8x128xf32>
    %cst_11 = arith.constant dense<0.000000e+00> : vector<8x8xf32>
    %17 = tpu.matmul %16, %13, %cst_11 {dimension_numbers = #tpu.dot_dimension_numbers<[1], [1], [0], [0], [0, 0, 1, 0], [], []>} : vector<8x128xf32>, vector<8x128xf32>, vector<8x8xf32> -> vector<8x8xf32>
    %c0_12 = arith.constant 0 : index
    %c0_13 = arith.constant 0 : index
    %c0_14 = arith.constant 0 : index
    %c0_15 = arith.constant 0 : index
    %18 = vector.load %arg5[%c0_12, %c0_13, %c0_14, %c0_15] : memref<1x4x8x8xf32, #tpu.memory_space<vmem>>, vector<1x1x8x8xf32>
    %19 = vector.shape_cast %18 : vector<1x1x8x8xf32> to vector<8x8xf32>
    %20 = vector.shape_cast %17 : vector<8x8xf32> to vector<1x1x8x8xf32>
    tpu.vector_store %arg5[%c0_12, %c0_13, %c0_14, %c0_15], %20 {strides = array<i32>} : memref<1x4x8x8xf32, #tpu.memory_space<vmem>>, vector<1x1x8x8xf32>,
    %21 = vector.extract_strided_slice %15 {offsets = [0, 128], sizes = [8, 128], strides = [1, 1]} : vector<8x512xf32> to vector<8x128xf32>
    %cst_16 = arith.constant dense<0.000000e+00> : vector<8x8xf32>
    %22 = tpu.matmul %21, %13, %cst_16 {dimension_numbers = #tpu.dot_dimension_numbers<[1], [1], [0], [0], [0, 0, 1, 0], [], []>} : vector<8x128xf32>, vector<8x128xf32>, vector<8x8xf32> -> vector<8x8xf32>
    %c0_17 = arith.constant 0 : index
    %c1 = arith.constant 1 : index
    %c0_18 = arith.constant 0 : index
    %c0_19 = arith.constant 0 : index
    %23 = vector.load %arg5[%c0_17, %c1, %c0_18, %c0_19] : memref<1x4x8x8xf32, #tpu.memory_space<vmem>>, vector<1x1x8x8xf32>
    %24 = vector.shape_cast %23 : vector<1x1x8x8xf32> to vector<8x8xf32>
    %25 = vector.shape_cast %22 : vector<8x8xf32> to vector<1x1x8x8xf32>
    tpu.vector_store %arg5[%c0_17, %c1, %c0_18, %c0_19], %25 {strides = array<i32>} : memref<1x4x8x8xf32, #tpu.memory_space<vmem>>, vector<1x1x8x8xf32>,
    %26 = vector.extract_strided_slice %15 {offsets = [0, 256], sizes = [8, 128], strides = [1, 1]} : vector<8x512xf32> to vector<8x128xf32>
    %cst_20 = arith.constant dense<0.000000e+00> : vector<8x8xf32>
    %27 = tpu.matmul %26, %13, %cst_20 {dimension_numbers = #tpu.dot_dimension_numbers<[1], [1], [0], [0], [0, 0, 1, 0], [], []>} : vector<8x128xf32>, vector<8x128xf32>, vector<8x8xf32> -> vector<8x8xf32>
    %c0_21 = arith.constant 0 : index
    %c2 = arith.constant 2 : index
    %c0_22 = arith.constant 0 : index
    %c0_23 = arith.constant 0 : index
    %28 = vector.load %arg5[%c0_21, %c2, %c0_22, %c0_23] : memref<1x4x8x8xf32, #tpu.memory_space<vmem>>, vector<1x1x8x8xf32>
    %29 = vector.shape_cast %28 : vector<1x1x8x8xf32> to vector<8x8xf32>
    %30 = vector.shape_cast %27 : vector<8x8xf32> to vector<1x1x8x8xf32>
    tpu.vector_store %arg5[%c0_21, %c2, %c0_22, %c0_23], %30 {strides = array<i32>} : memref<1x4x8x8xf32, #tpu.memory_space<vmem>>, vector<1x1x8x8xf32>,
    %31 = vector.extract_strided_slice %15 {offsets = [0, 384], sizes = [8, 128], strides = [1, 1]} : vector<8x512xf32> to vector<8x128xf32>
    %cst_24 = arith.constant dense<0.000000e+00> : vector<8x8xf32>
    %32 = tpu.matmul %31, %13, %cst_24 {dimension_numbers = #tpu.dot_dimension_numbers<[1], [1], [0], [0], [0, 0, 1, 0], [], []>} : vector<8x128xf32>, vector<8x128xf32>, vector<8x8xf32> -> vector<8x8xf32>
    %c0_25 = arith.constant 0 : index
    %c3 = arith.constant 3 : index
    %c0_26 = arith.constant 0 : index
    %c0_27 = arith.constant 0 : index
    %33 = vector.load %arg5[%c0_25, %c3, %c0_26, %c0_27] : memref<1x4x8x8xf32, #tpu.memory_space<vmem>>, vector<1x1x8x8xf32>
    %34 = vector.shape_cast %33 : vector<1x1x8x8xf32> to vector<8x8xf32>
    %35 = vector.shape_cast %32 : vector<8x8xf32> to vector<1x1x8x8xf32>
    tpu.vector_store %arg5[%c0_25, %c3, %c0_26, %c0_27], %35 {strides = array<i32>} : memref<1x4x8x8xf32, #tpu.memory_space<vmem>>, vector<1x1x8x8xf32>,
    return
  }
  func.func @transform_0(%arg0: i32) -> (i32, i32, i32) {
    %c0_i32 = arith.constant 0 : i32
    %c0_i32_0 = arith.constant 0 : i32
    %c0_i32_1 = arith.constant 0 : i32
    return %arg0, %c0_i32, %c0_i32_0 : i32, i32, i32
  }
  func.func @transform_1(%arg0: i32) -> (i32, i32) {
    %c0_i32 = arith.constant 0 : i32
    %c0_i32_0 = arith.constant 0 : i32
    %c0_i32_1 = arith.constant 0 : i32
    return %c0_i32, %c0_i32_0 : i32, i32
  }
  func.func @transform_2(%arg0: i32) -> (i32, i32) {
    %c0_i32 = arith.constant 0 : i32
    %c0_i32_0 = arith.constant 0 : i32
    %c0_i32_1 = arith.constant 0 : i32
    return %c0_i32, %c0_i32_0 : i32, i32
  }
  func.func @transform_3(%arg0: i32) -> (i32, i32) {
    %c0_i32 = arith.constant 0 : i32
    %c0_i32_0 = arith.constant 0 : i32
    %c0_i32_1 = arith.constant 0 : i32
    return %c0_i32, %c0_i32_0 : i32, i32
  }
  func.func @transform_4(%arg0: i32) -> (i32, i32, i32, i32) {
    %c0_i32 = arith.constant 0 : i32
    %c0_i32_0 = arith.constant 0 : i32
    %c0_i32_1 = arith.constant 0 : i32
    %c0_i32_2 = arith.constant 0 : i32
    return %arg0, %c0_i32, %c0_i32_0, %c0_i32_1 : i32, i32, i32, i32
  }
}

</mosaic_0001>

<bundles_post_ra>
// kernel: tpu_custom_call.1
= control target key start
LH: loop header
LB: loop body
LE: loop exit
PB: predicated region body
PF: predicated region fallthrough
CT: control target
= control target key end

     0   :  { %9 = vsyncpa [#allocation3], 0  ;;  %s1176_s0 = inlined_call_operand.hbm [shape: f32[2,8,32], index: 0, kind: input, shape index: {}]   ;;  %s1177_s1 = inlined_call_operand.hbm [shape: f32[32,256], index: 1, kind: input, shape index: {}]   ;;  %s1178_s2 = inlined_call_operand.hbm [shape: f32[1,256], index: 2, kind: input, shape index: {}]   ;;  %s1179_s3 = inlined_call_operand.hbm [shape: f32[128,512], index: 3, kind: input, shape index: {}]   ;;  %s1180_s4 = inlined_call_operand.hbm [shape: f32[2,4,8,8], index: 4, kind: output, shape index: {}]  }
   0x1   :  { %11 = vsyncpa [#allocation3 + $0x1], 0 }
   0x2   :  { %12 = vsyncpa [#allocation6], 0 }
   0x3   :  { %13 = vsyncpa [#allocation9], 0 }
   0x4   :  { %14 = vsyncpa [#allocation4], 0 }
   0x5   :  { %16 = vsyncpa [#allocation4 + $0x1], 0  ;;  %s1013_s15 = smov 0   ;;  %s1015_s16 = smov 0  }
   0x6   :  { %s1017_s17 = smov 0   ;;  %s1019_s18 = smov 0  }
   0x7 LB: > { %s153_s21 = sshll.u32 %s1177_s1, 4  ;;  %s1037_s22 = sadd.s32 4294967295, %s977_s18   ;;  %s977_s18 = sphi %s1019_s18, %s1191_s18   ;;  %s973_s17 = sphi %s1017_s17, %s1190_s17   ;;  %s969_s16 = sphi %s1015_s16, %s1189_s16   ;;  %s965_s15 = sphi %s1013_s15, %s1188_s15   ;;  %s154_s21 = int_to_ptr.hbm [resolvable:$true] %s153_s21 }
   0x8   : > { %p676_p0 = scmp.ge.s32.totalorder %s977_s18, 1  ;;  %p43_p1 = scmp.eq.s32.totalorder %s1037_s22, 0 }
   0x9   : > { %p142_p2 = scmp.lt.s32.totalorder %s977_s18, 3  ;;  %s979_s24 = smov [#allocation5]  }
   0xa   : > { %s155_s25 = sshll.u32 %s979_s24, 4  ;;  %s168_s28 = sshll.u32 %s1178_s2, 4  ;;  %s156_s25 = int_to_ptr.vmem [resolvable:$true] %s155_s25  ;;  %s169_s28 = int_to_ptr.hbm [resolvable:$true] %s168_s28 }
   0xb   : > { %p1042_p3 = pnand %p676_p0, %p142_p2  ;;  %s179_s6 = sshll.u32 %s1179_s3, 4  ;;  %s180_s6 = int_to_ptr.hbm [resolvable:$true] %s179_s6 }
   0xc   : > { %s980_s7 = smov [#allocation7]   ;;  %s981_s9 = smov 256  }
   0xd   : > { %p716_p4 = pneg %p1042_p3  ;;  %s170_s8 = sshll.u32 %s980_s7, 4  ;;  %s171_s8 = int_to_ptr.vmem [resolvable:$true] %s170_s8 }
   0xe   : > { %s982_s10 = smov 16   ;;  %s983_s11 = smov [#allocation8]  }
   0xf   : > { %p1054_p6 = pnand %p716_p4, %p43_p1  ;;  %s181_s12 = sshll.u32 %s983_s11, 4  ;;  %s182_s12 = int_to_ptr.vmem [resolvable:$true] %s181_s12 }
  0x10   : > { %s984_s13 = smov 512   ;;  %s985_s14 = smov 32  }
  0x11   : > { %719 = dma.hbm_to_vmem [thread:$0]  (!%p1054_p6), %s154_s21, 1024, %s156_s25, [#allocation6], %s981_s9, %s981_s9, %s982_s10  }
  0x12   : > { %722 = dma.hbm_to_vmem [thread:$0]  (!%p1054_p6), %s169_s28, 32, %s171_s8, [#allocation6]  }
  0x13   : > { %725 = dma.hbm_to_vmem [thread:$0]  (!%p1054_p6), %s180_s6, 8192, %s182_s12, [#allocation9], %s984_s13, %s984_s13, %s985_s14  }
  0x14   : > { %s675_s19 = sadd.s32 4294967294, %s977_s18   ;;  %s1069_s20 = sadd.s32 1, %s977_s18  }
  0x15   : > { %s29_s21 = sadd.s32 1, %s973_s17  ;;  %s26_s24 = ssub.s32 %s977_s18, %s1069_s20 }
  0x16   : > { %p36_p7 = scmp.ne.s32.totalorder %s973_s17, %s969_s16  ;;  %p27_p8 = scmp.eq.s32.totalorder %s26_s24, 0 }
  0x17   : > { %p37_p9 = scmp.eq.s32.totalorder %s977_s18, 0  ;;  %p42_p10 = scmp.ne.s32.totalorder %s969_s16, %s965_s15 }
  0x18   : > { %p129_p11 = scmp.eq.s32.totalorder %s1037_s22, 1  ;;  %p135_p0 = scmp.eq.s32.totalorder %s675_s19, 1 }
  0x19   : > { %s1081_s25 = scalar_select %p27_p8, %s973_s17, %s29_s21  }
  0x1a   : > { %p1085_p12 = por %p43_p1, %p42_p10  ;;  %p1089_p13 = por %p129_p11, %p36_p7 }
  0x1b   : > { %p38_p2 = por %p37_p9, %p36_p7  ;;  %s195_s28 = sand.u32 1, %s973_s17  }
  0x1c   : > { %p1094_p4 = por %p135_p0, %p42_p10  ;;  %p737_p6 = scmp.lt.s32.totalorder %s977_s18, 2 }
  0x1d   : > { %s681_s30 = sshll.u32 %s195_s28, 3  ;;  %s682_s5 = sshll.u32 %s977_s18, 3 }
  0x1e   : > { %s203_s8 = scalar_lea.hbm %s1176_s0, %s682_s5  ;;  %s199_s10 = scalar_lea.vmem [#allocation2], %s681_s30 }
  0x1f   : > { %s205_s9 = sshll.u32 %s203_s8, 4  ;;  %s207_s11 = sshll.u32 %s199_s10, 4  ;;  %s206_s9 = int_to_ptr.hbm [resolvable:$true] %s205_s9  ;;  %s208_s11 = int_to_ptr.vmem [resolvable:$true] %s207_s11 }
  0x20   : > { %p1103_p8 = pnand %p737_p6, %p38_p2  ;;  %s196_s13 = scalar_lea.sflag [#allocation3], %s195_s28 }
  0x21   : > { %s873_s14 = sshra.s32 %s206_s9, 4  ;;  %s880_s30 = scalar_lea.hbm %s1176_s0, 16  ;;  %s874_s14 = int_to_ptr.hbm [resolvable:$true] %s873_s14 }
  0x22   : > { %s875_s19 = scalar_lea.hbm %s874_s14, 8  ;;  %p877_p9 = pneg %p1103_p8 }
  0x23   : > { %p876_p7 = scmp.ne.s32.totalorder %s874_s14, %s875_s19  ;;  %p881_p0 = scmp.lt.s32.totalorder %s874_s14, %s1176_s0 }
  0x24   : > { %p882_p2 = scmp.lt.s32.totalorder %s880_s30, %s875_s19 }
  0x25   : > { %p878_p10 = pnand %p877_p9, %p876_p7 }
  0x26   : > { %p883_p6 = por %p882_p2, %p881_p0 }
  0x27   : > { %p879_p11 = pneg %p878_p10 }
  0x29   : > { %p884_p5 = pnand %p883_p6, %p879_p11 }
  0x2b   : > { %887 = shalt.err (!%p884_p5)
}
  0x2c   : > { %729 = dma.hbm_to_vmem [thread:$0]  (!%p1103_p8), %s206_s9, 128, %s208_s11, %s196_s13  }
  0x2d   : > { %216 = sbr.rel (%p1042_p3) target bundleno = 460 (0x1cc), region = 36  ;;  %s1120_s28 = sand.u32 (!%p1042_p3), 1, %s969_s16  }
  0x2e   : > { %s684_s7 = sshll.u32 (!%p1042_p3), %s1120_s28, 3  ;;  %s219_s8 = scalar_lea.sflag (!%p1042_p3), [#allocation3], %s1120_s28 }
  0x2f   : > { %s222_s10 = scalar_lea.vmem (!%p1042_p3), [#allocation2], %s684_s7 }
  0x32   : > { %948 = dma.done.wait (%p1085_p12), %s219_s8, 128  }
  0x33   : > { %950 = vsyncadd (%p1085_p12), %s219_s8, 4294967168 }
  0x34   : > { %952 = dma.done.wait (%p43_p1), [#allocation6], 1056  }
  0x35   : > { %954 = vsyncadd (%p43_p1), [#allocation6], 4294966240 }
  0x36   : > { %956 = dma.done.wait (%p43_p1), [#allocation9], 8192  }
  0x37   : > { %958 = vsyncadd (%p43_p1), [#allocation9], 4294959104  ;;  %v273_v0 = vld [vmem:[#allocation5 + $0x30] sm:$0xff]  ;;  %v271_v1 = vld [vmem:[#allocation5 + $0x20] sm:$0xff]  ;;  %vm281_vm1 = vcmask 261120   ;;  %s688_s23 = sshll.u32 %s1120_s28, 5 }
  0x38   : > { %297 = vmatpush.msra.mxu0 %v273_v0  ;;  %v263_v2 = vld [vmem:[%s222_s10] sm:$0xff]  ;;  %v272_v6 = vld [vmem:[#allocation5 + $0x28] sm:$0xff]  ;;  %v267_v10 = vld [vmem:[#allocation5] sm:$0xff]  ;;  %vm489_vm2 = vcmask 64512   ;;  %s262_s26 = scalar_lea.vmem [#allocation10], %s688_s23  ;;  %s699_s9 = sshll.u32 %s1037_s22, 5 }
  0x39   : > { %v274_v3 = vld [vmem:[#allocation5 + $0x38] sm:$0xff]  ;;  %v269_v4 = vld [vmem:[#allocation5 + $0x10] sm:$0xff]  ;;  %vm264_vm0 = vcmp.ge.f32.partialorder %v263_v2, 0.0  ;;  %v265_v5 = vmul.f32 0.01, %v263_v2  ;;  %v385_v8 = vld [vmem:[#allocation8 + $0x1e0] sm:$0xff]  ;;  %s569_s13 = scalar_lea.hbm %s1180_s4, %s699_s9 }
  0x3a   : > { %317 = vmatpush.msra.mxu1 %v274_v3  ;;  %298 = vmatpush.msra.mxu0 %v271_v1  ;;  %v270_v7 = vld [vmem:[#allocation5 + $0x18] sm:$0xff]  ;;  %v386_v9 = vld [vmem:[#allocation8 + $0x1e8] sm:$0xff]  ;;  %v381_v11 = vld [vmem:[#allocation8 + $0x1c0] sm:$0xff]  ;;  %s570_s14 = sshll.u32 %s262_s26, 4  ;;  %s572_s19 = sshll.u32 %s569_s13, 4  ;;  %s571_s14 = int_to_ptr.vmem [resolvable:$true] %s570_s14  ;;  %s573_s19 = int_to_ptr.hbm [resolvable:$true] %s572_s19 }
  0x3b   : > { %389 = vmatpush.msra.mxu2 %v385_v8  ;;  %v382_v12 = vld [vmem:[#allocation8 + $0x1c8] sm:$0xff]  ;;  %v1136_v13 = vsel %vm264_vm0, %v263_v2, %v265_v5  ;;  %409 = vmatpush.msra.mxu3 %v386_v9  ;;  %v387_v15 = vld [vmem:[#allocation8 + $0x1f0] sm:$0xff]  ;;  %v388_v16 = vld [vmem:[#allocation8 + $0x1f8] sm:$0xff]  ;;  %s558_s21 = scalar_lea.sflag [#allocation4], %s1120_s28  ;;  %s917_s24 = sshra.s32 %s573_s19, 4  ;;  %s918_s24 = int_to_ptr.hbm [resolvable:$true] %s917_s24 }
  0x3c   : > { %318 = vmatpush.msra.mxu1 %v272_v6  ;;  %299 = vmatpush.msra.mxu0 %v269_v4  ;;  %v268_v14 = vld [vmem:[#allocation5 + $0x8] sm:$0xff]  ;;  %v383_v19 = vld [vmem:[#allocation8 + $0x1d0] sm:$0xff]  ;;  %v384_v20 = vld [vmem:[#allocation8 + $0x1d8] sm:$0xff]  ;;  %s919_s30 = scalar_lea.hbm %s918_s24, 32  ;;  %s923_s6 = scalar_lea.hbm %s1180_s4, 64 }
  0x3d   : > { %390 = vmatpush.msra.mxu2 %v381_v11  ;;  %410 = vmatpush.msra.mxu3 %v382_v12  ;;  %v377_v17 = vld [vmem:[#allocation8 + $0x1a0] sm:$0xff]  ;;  %v378_v18 = vld [vmem:[#allocation8 + $0x1a8] sm:$0xff]  ;;  %v379_v23 = vld [vmem:[#allocation8 + $0x1b0] sm:$0xff]  ;;  %p920_p1 = scmp.ne.s32.totalorder %s918_s24, %s919_s30  ;;  %p924_p12 = scmp.lt.s32.totalorder %s918_s24, %s1180_s4 }
  0x3e   : > { %319 = vmatpush.msra.mxu1 %v270_v7  ;;  %300 = vmatpush.msra.mxu0 %v267_v10  ;;  %v373_v21 = vld [vmem:[#allocation8 + $0x180] sm:$0xff]  ;;  %v374_v22 = vld [vmem:[#allocation8 + $0x188] sm:$0xff]  ;;  %v380_v24 = vld [vmem:[#allocation8 + $0x1b8] sm:$0xff]  ;;  %p925_p8 = scmp.lt.s32.totalorder %s923_s6, %s919_s30 }
  0x3f   : > { %689 = vmatmul.msk.f32.vlgmr.msra.gmra.mxu0 %vm281_vm1, %v1136_v13  ;;  %391 = vmatpush.msra.mxu2 %v377_v17  ;;  %v369_v25 = vld [vmem:[#allocation8 + $0x160] sm:$0xff]  ;;  %v370_v26 = vld [vmem:[#allocation8 + $0x168] sm:$0xff]  ;;  %v375_v27 = vld [vmem:[#allocation8 + $0x190] sm:$0xff]  ;;  %p921_p3 = pnand %p920_p1, %p1089_p13 }
  0x40   : > { %320 = vmatpush.msra.mxu1 %v268_v14  ;;  %429 = vmatpush.msrb.mxu0 %v387_v15  ;;  %v376_v28 = vld [vmem:[#allocation8 + $0x198] sm:$0xff]  ;;  %v365_v29 = vld [vmem:[#allocation8 + $0x140] sm:$0xff]  ;;  %v366_v30 = vld [vmem:[#allocation8 + $0x148] sm:$0xff]  ;;  %p926_p7 = por %p925_p8, %p924_p12 }
  0x41   : > { %411 = vmatpush.msra.mxu3 %v378_v18  ;;  %392 = vmatpush.msra.mxu2 %v373_v21  ;;  %v371_v31 = vld [vmem:[#allocation8 + $0x170] sm:$0xff]  ;;  %v372_v32 = vld [vmem:[#allocation8 + $0x178] sm:$0xff]  ;;  %v361_v33 = vld [vmem:[#allocation8 + $0x120] sm:$0xff]  ;;  %p922_p5 = pneg %p921_p3 }
  0x42   : > { %449 = vmatpush.msrb.mxu1 %v388_v16  ;;  %430 = vmatpush.msrb.mxu0 %v383_v19  ;;  %v362_v34 = vld [vmem:[#allocation8 + $0x128] sm:$0xff]  ;;  %v367_v35 = vld [vmem:[#allocation8 + $0x150] sm:$0xff]  ;;  %v368_v36 = vld [vmem:[#allocation8 + $0x158] sm:$0xff] }
  0x43   : > { %412 = vmatpush.msra.mxu3 %v374_v22  ;;  %393 = vmatpush.msra.mxu2 %v369_v25  ;;  %v357_v37 = vld [vmem:[#allocation8 + $0x100] sm:$0xff]  ;;  %v358_v38 = vld [vmem:[#allocation8 + $0x108] sm:$0xff]  ;;  %v363_v39 = vld [vmem:[#allocation8 + $0x130] sm:$0xff]  ;;  %p927_p9 = pnand %p926_p7, %p922_p5 }
  0x44   : > { %450 = vmatpush.msrb.mxu1 %v384_v20  ;;  %431 = vmatpush.msrb.mxu0 %v379_v23  ;;  %v364_v40 = vld [vmem:[#allocation8 + $0x138] sm:$0xff]  ;;  %v353_v41 = vld [vmem:[#allocation8 + $0xe0] sm:$0xff]  ;;  %v354_v42 = vld [vmem:[#allocation8 + $0xe8] sm:$0xff] }
  0x45   : > { %413 = vmatpush.msra.mxu3 %v370_v26  ;;  %394 = vmatpush.msra.mxu2 %v365_v29  ;;  %v359_v43 = vld [vmem:[#allocation8 + $0x110] sm:$0xff]  ;;  %v360_v44 = vld [vmem:[#allocation8 + $0x118] sm:$0xff]  ;;  %v349_v45 = vld [vmem:[#allocation8 + $0xc0] sm:$0xff] }
  0x46   : > { %451 = vmatpush.msrb.mxu1 %v380_v24  ;;  %432 = vmatpush.msrb.mxu0 %v375_v27  ;;  %v350_v46 = vld [vmem:[#allocation8 + $0xc8] sm:$0xff]  ;;  %v355_v47 = vld [vmem:[#allocation8 + $0xf0] sm:$0xff]  ;;  %v356_v48 = vld [vmem:[#allocation8 + $0xf8] sm:$0xff] }
  0x47   : > { %414 = vmatpush.msra.mxu3 %v366_v30  ;;  %395 = vmatpush.msra.mxu2 %v361_v33  ;;  %v345_v49 = vld [vmem:[#allocation8 + $0xa0] sm:$0xff]  ;;  %v346_v50 = vld [vmem:[#allocation8 + $0xa8] sm:$0xff]  ;;  %v351_v51 = vld [vmem:[#allocation8 + $0xd0] sm:$0xff] }
  0x48   : > { %452 = vmatpush.msrb.mxu1 %v376_v28  ;;  %433 = vmatpush.msrb.mxu0 %v371_v31  ;;  %v352_v52 = vld [vmem:[#allocation8 + $0xd8] sm:$0xff]  ;;  %v341_v53 = vld [vmem:[#allocation8 + $0x80] sm:$0xff]  ;;  %v342_v54 = vld [vmem:[#allocation8 + $0x88] sm:$0xff] }
  0x49   : > { %415 = vmatpush.msra.mxu3 %v362_v34  ;;  %396 = vmatpush.msra.mxu2 %v357_v37  ;;  %v347_v55 = vld [vmem:[#allocation8 + $0xb0] sm:$0xff]  ;;  %v348_v56 = vld [vmem:[#allocation8 + $0xb8] sm:$0xff]  ;;  %v337_v57 = vld [vmem:[#allocation8 + $0x60] sm:$0xff] }
  0x4a   : > { %453 = vmatpush.msrb.mxu1 %v372_v32  ;;  %434 = vmatpush.msrb.mxu0 %v367_v35  ;;  %v343_v58 = vld [vmem:[#allocation8 + $0x90] sm:$0xff]  ;;  %v344_v59 = vld [vmem:[#allocation8 + $0x98] sm:$0xff]  ;;  %v338_v60 = vld [vmem:[#allocation8 + $0x68] sm:$0xff] }
  0x4b   : > { %416 = vmatpush.msra.mxu3 %v358_v38  ;;  %397 = vmatpush.msra.mxu2 %v353_v41  ;;  %v333_v61 = vld [vmem:[#allocation8 + $0x40] sm:$0xff]  ;;  %v339_v62 = vld [vmem:[#allocation8 + $0x70] sm:$0xff]  ;;  %v340_v63 = vld [vmem:[#allocation8 + $0x78] sm:$0xff] }
  0x4c   : > { %454 = vmatpush.msrb.mxu1 %v368_v36  ;;  %435 = vmatpush.msrb.mxu0 %v363_v39  ;;  %v334_v0 = vld [vmem:[#allocation8 + $0x48] sm:$0xff]  ;;  %v335_v1 = vld [vmem:[#allocation8 + $0x50] sm:$0xff]  ;;  %v336_v2 = vld [vmem:[#allocation8 + $0x58] sm:$0xff] }
  0x4d   : > { %417 = vmatpush.msra.mxu3 %v354_v42  ;;  %398 = vmatpush.msra.mxu2 %v349_v45  ;;  %v329_v3 = vld [vmem:[#allocation8 + $0x20] sm:$0xff]  ;;  %v330_v4 = vld [vmem:[#allocation8 + $0x28] sm:$0xff]  ;;  %v331_v5 = vld [vmem:[#allocation8 + $0x30] sm:$0xff] }
  0x4e   : > { %455 = vmatpush.msrb.mxu1 %v364_v40  ;;  %436 = vmatpush.msrb.mxu0 %v359_v43  ;;  %v332_v6 = vld [vmem:[#allocation8 + $0x38] sm:$0xff]  ;;  %v325_v7 = vld [vmem:[#allocation8] sm:$0xff]  ;;  %v326_v8 = vld [vmem:[#allocation8 + $0x8] sm:$0xff] }
  0x4f   : > { %418 = vmatpush.msra.mxu3 %v350_v46  ;;  %399 = vmatpush.msra.mxu2 %v345_v49  ;;  %v327_v9 = vld [vmem:[#allocation8 + $0x10] sm:$0xff]  ;;  %v328_v10 = vld [vmem:[#allocation8 + $0x18] sm:$0xff] }
  0x50   : > { %456 = vmatpush.msrb.mxu1 %v360_v44  ;;  %437 = vmatpush.msrb.mxu0 %v355_v47  ;;  %v275_v11 = vld [vmem:[#allocation7] sm:$0x3] }
  0x51   : > { %419 = vmatpush.msra.mxu3 %v346_v50  ;;  %400 = vmatpush.msra.mxu2 %v341_v53  ;;  %v277_v12 = vperm.slane %v275_v11, 0  ;;  %v278_v15 = vperm.slane %v275_v11, 1 }
  0x52   : > { %457 = vmatpush.msrb.mxu1 %v356_v48  ;;  %438 = vmatpush.msrb.mxu0 %v351_v51 }
  0x53   : > { %420 = vmatpush.msra.mxu3 %v342_v54  ;;  %690 = vmatmul.msk.f32.vlgmr.msra.gmra.mxu1 %vm281_vm1, %v1136_v13 }
  0x54   : > { %458 = vmatpush.msrb.mxu1 %v352_v52  ;;  %439 = vmatpush.msrb.mxu0 %v347_v55 }
  0x55   : > { %401 = vmatpush.msra.mxu2 %v337_v57  ;;  %421 = vmatpush.msra.mxu3 %v338_v60 }
  0x56   : > { %459 = vmatpush.msrb.mxu1 %v348_v56  ;;  %440 = vmatpush.msrb.mxu0 %v343_v58 }
  0x57   : > { %402 = vmatpush.msra.mxu2 %v333_v61  ;;  %422 = vmatpush.msra.mxu3 %v334_v0 }
  0x58   : > { %460 = vmatpush.msrb.mxu1 %v344_v59  ;;  %441 = vmatpush.msrb.mxu0 %v339_v62 }
  0x59   : > { %403 = vmatpush.msra.mxu2 %v329_v3  ;;  %423 = vmatpush.msra.mxu3 %v330_v4 }
  0x5a   : > { %461 = vmatpush.msrb.mxu1 %v340_v63  ;;  %442 = vmatpush.msrb.mxu0 %v335_v1 }
  0x5b   : > { %404 = vmatpush.msra.mxu2 %v325_v7  ;;  %424 = vmatpush.msra.mxu3 %v326_v8 }
  0x5c   : > { %462 = vmatpush.msrb.mxu1 %v336_v2  ;;  %443 = vmatpush.msrb.mxu0 %v331_v5 }
  0x5e   : > { %463 = vmatpush.msrb.mxu1 %v332_v6  ;;  %444 = vmatpush.msrb.mxu0 %v327_v9 }
  0x60   : > { %464 = vmatpush.msrb.mxu1 %v328_v10 }
  0xbc   : > { %v302_v13 = vpop.f32.mrf.mxu0 }
  0xbd   : > { %v303_v14 = vadd.f32 %v302_v13, %v277_v12 }
  0xbf   : > { %405 = vmatmul.f32.vlgmr.msra.gmra.mxu2 %v303_v14  ;;  %425 = vmatmul.f32.vlgmr.msra.gmra.mxu3 %v303_v14 }
  0xc0   : > { %445 = vmatmul.f32.vlgmr.msrb.gmra.mxu0 %v303_v14  ;;  %465 = vmatmul.f32.vlgmr.msrb.gmra.mxu1 %v303_v14 }
  0xd0   : > { %v322_v16 = vpop.f32.mrf.mxu1 }
  0xd1   : > { %v323_v17 = vadd.f32 %v322_v16, %v278_v15 }
  0xd3   : > { %528 = vmatpush.xpose.msra.mxu0 %v323_v17  ;;  %550 = vmatpush.xpose.msra.mxu1 %v323_v17 }
  0xd4   : > { %484 = vmatpush.xpose.msrb.mxu2 %v323_v17  ;;  %506 = vmatpush.xpose.msrb.mxu3 %v323_v17 }
 0x13d   : > { %v446_v18 = vpop.f32.mrf.mxu0  ;;  %v466_v19 = vpop.f32.mrf.mxu1 }
 0x13e   : > { %529 = vmatmul.f32.vlgmr.msra.gmra.mxu0 %v446_v18  ;;  %551 = vmatmul.f32.vlgmr.msra.gmra.mxu1 %v466_v19 }
 0x142   : > { %v406_v20 = vpop.f32.mrf.mxu2  ;;  %v426_v21 = vpop.f32.mrf.mxu3 }
 0x143   : > { %485 = vmatmul.f32.vlgmr.msrb.gmra.mxu2 %v406_v20  ;;  %507 = vmatmul.f32.vlgmr.msrb.gmra.mxu3 %v426_v21 }
 0x1bb   : > { %v530_v22 = vpop.f32.mrf.mxu0  ;;  %v552_v23 = vpop.f32.mrf.mxu1 }
 0x1bc   : > { %692 = vst.msk [vmem:[%s262_s26 + $0x10] sm:$0xff] %vm489_vm2, %v530_v22 }
 0x1bd   : > { %693 = vst.msk [vmem:[%s262_s26 + $0x18] sm:$0xff] %vm489_vm2, %v552_v23 }
 0x1c6   : > { %v486_v24 = vpop.f32.mrf.mxu2  ;;  %v508_v25 = vpop.f32.mrf.mxu3 }
 0x1c7   : > { %490 = vst.msk [vmem:[%s262_s26] sm:$0xff] %vm489_vm2, %v486_v24 }
 0x1c8   : > { %691 = vst.msk [vmem:[%s262_s26 + $0x8] sm:$0xff] %vm489_vm2, %v508_v25 }
 0x1c9   : > { %930 = shalt.err (!%p927_p9)
}
 0x1ca   : > { %s986_s28 = smov 128   ;;  %s987_s10 = smov 8  }
 0x1cb   : > { %714 = dma.vmem_to_hbm [thread:$0]  (%p1089_p13), %s571_s14, 512, %s573_s19, %s558_s21, %s986_s28, %s986_s28, %s987_s10  }
 0x1cc PF: > { %s587_s23 = sand.u32 1, %s965_s15   ;;  %p1187_p10 = scmp.ge.s32.totalorder %s977_s18, 2 }
 0x1cd   : > { %s588_s26 = scalar_lea.sflag [#allocation4], %s587_s23 }
 0x1ce   : > { %p731_p11 = pnand %p1187_p10, %p1094_p4 }
 0x1d0   : > { %p732_p0 = pneg %p731_p11 }
 0x1d2   : > { %960 = dma.done.wait (%p732_p0), %s588_s26, 512  }
 0x1d3   : > { %962 = vsyncadd (%p732_p0), %s588_s26, 4294966784  ;;  %p19_p2 = scmp.ge.s32.totalorder %s1069_s20, 4   ;;  %s1188_s15 = smov %s969_s16 }
 0x1d4   : > { %s1189_s16 = smov %s973_s17  ;;  %s1190_s17 = smov %s1081_s25 }
 0x1d5   : > { %s1191_s18 = smov %s1069_s20  ;;  %21 = sbr.rel (!%p19_p2) target bundleno = 7 (0x7), region = 96 }
 0x1da   :  { %594 = vsyncpa [#allocation3], 1 }
 0x1db   :  { %596 = vsyncpa [#allocation3 + $0x1], 1 }
 0x1dc   :  { %597 = vsyncpa [#allocation6], 1 }
 0x1dd   :  { %598 = vsyncpa [#allocation9], 1 }
 0x1de   :  { %599 = vsyncpa [#allocation4], 1 }
 0x1df   :  { %601 = vsyncpa [#allocation4 + $0x1], 1 }

</bundles_post_ra>
